<compile_context>
chip_gen: v7x
topology: tpu7x:2x2x1
jax: 0.10.0
libtpu: 0.0.40
codegen_flags: <defaults>
</compile_context>

<pallas_src>
import functools

import jax
import jax.numpy as jnp
from jax import lax
from jax.experimental import pallas as pl
from jax.experimental.pallas import tpu as pltpu

EPS = 1e-5
_LANE = 128


# ---------------------------------------------------------------------------
# Generation-aware knobs
# ---------------------------------------------------------------------------
def _tpu_target():
    """Returns (vmem_limit_bytes, num_tensorcores) with conservative fallbacks."""
    vmem_cap = 64 * 1024 * 1024      # conservative default (v7x per-TC VMEM)
    cores = 1
    try:
        info = pltpu.get_tpu_info()
        v = getattr(info, "vmem_capacity_bytes", None)
        if isinstance(v, int) and v > 0:
            vmem_cap = v
        for name in ("num_cores", "num_tensorcores", "tensorcore_count",
                     "cores_per_chip"):
            c = getattr(info, name, None)
            if isinstance(c, int) and c > 0:
                cores = c
                break
    except Exception:
        pass
    if cores == 1:
        try:  # v7x parts have 2 TensorCores per chip
            if "v7" in jax.devices()[0].device_kind.lower():
                cores = 2
        except Exception:
            pass
    # v5e/v6e: 128 MiB physical -> 64 MiB limit; v7x: 64 MiB -> 32 MiB limit.
    vmem_limit = max(32 * 1024 * 1024, min(vmem_cap // 2, 64 * 1024 * 1024))
    return vmem_limit, cores


# ---------------------------------------------------------------------------
# Kernel 1: T >= 128 — normalize over the sublane (F) axis in native layout
# ---------------------------------------------------------------------------
def _layernorm_sublane_kernel(x_ref, g_ref, b_ref, o_ref):
    # x_ref: (r_blk, F, t_blk); normalize over the F (sublane) axis.
    x = x_ref[...].astype(jnp.float32)
    mean = jnp.mean(x, axis=1, keepdims=True)                    # (r, 1, t)
    centered = x - mean
    var = jnp.mean(centered * centered, axis=1, keepdims=True)   # biased
    inv_std = lax.rsqrt(var + EPS)
    g = g_ref[...].astype(jnp.float32)                           # (1, F, 1)
    b = b_ref[...].astype(jnp.float32)                           # (1, F, 1)
    o_ref[...] = (centered * inv_std * g + b).astype(o_ref.dtype)


def _layer_norm_sublane(x3, gamma, beta, vmem_limit, num_cores, target_bytes):
    bc, n_feats, t = x3.shape
    itemsize = x3.dtype.itemsize

    # Lane (last) dim: full T is always layout-legal; cap very long T at a
    # 1024-wide multiple-of-128 chunk (Pallas masks the tail block).
    t_block = t if t <= 1024 else 1024
    r_block = max(1, target_bytes // (n_feats * t_block * itemsize))
    r_block = min(r_block, bc)
    # Split only on multi-TC parts (v7x): aim for >=2 steps per core so each
    # core gets prefetch/writeback overlap.  Single-TC v5e/v6e keep max tile.
    if num_cores > 1 and bc >= 2 * num_cores:
        r_block = min(r_block, pl.cdiv(bc, 2 * num_cores))

    r_steps = pl.cdiv(bc, r_block)
    t_steps = pl.cdiv(t, t_block)

    g3 = gamma.reshape(1, n_feats, 1)
    b3 = beta.reshape(1, n_feats, 1)

    # Put the longer parallel axis first (megacore sharding on v7x).
    if r_steps >= t_steps:
        grid = (r_steps, t_steps)
        x_map = lambda r, tt: (r, 0, tt)
    else:
        grid = (t_steps, r_steps)
        x_map = lambda tt, r: (r, 0, tt)
    const_map = lambda a, b: (0, 0, 0)   # gamma/beta: resident, not re-DMA'd

    return pl.pallas_call(
        _layernorm_sublane_kernel,
        out_shape=jax.ShapeDtypeStruct((bc, n_feats, t), x3.dtype),
        grid_spec=pltpu.PrefetchScalarGridSpec(
            num_scalar_prefetch=0,
            grid=grid,
            in_specs=[
                pl.BlockSpec((r_block, n_feats, t_block), x_map),
                pl.BlockSpec((1, n_feats, 1), const_map),
                pl.BlockSpec((1, n_feats, 1), const_map),
            ],
            out_specs=pl.BlockSpec((r_block, n_feats, t_block), x_map),
        ),
        compiler_params=pltpu.CompilerParams(
            dimension_semantics=("parallel", "parallel"),
            vmem_limit_bytes=vmem_limit,
        ),
    )(x3, g3, b3)


# ---------------------------------------------------------------------------
# Kernel 2: T < 128 — lane-dense path over the flattened (bc, F*T) layout
# ---------------------------------------------------------------------------
def _layernorm_flat_kernel(x_ref, mr_ref, g_ref, b_ref, o_ref, *, n_feats):
    # x_ref: (r_blk, F*T), flat index k = f*T + t.  mr[k, t] = 1 iff k % T == t,
    # so x @ mr sums over f at fixed t (exact 0/1 weights, HIGHEST precision).
    x = x_ref[...].astype(jnp.float32)
    mr = mr_ref[...]
    inv_f = 1.0 / n_feats
    sums = jnp.dot(x, mr, preferred_element_type=jnp.float32,
                   precision=lax.Precision.HIGHEST)              # (r, T)
    mean_t = sums * inv_f
    mean = jnp.tile(mean_t, (1, n_feats))                        # exact broadcast
    c = x - mean
    var_t = jnp.dot(c * c, mr, preferred_element_type=jnp.float32,
                    precision=lax.Precision.HIGHEST) * inv_f     # biased
    inv_t = lax.rsqrt(var_t + EPS)
    inv = jnp.tile(inv_t, (1, n_feats))
    g = g_ref[...]                                               # (1, F*T) f32
    b = b_ref[...]
    o_ref[...] = (c * inv * g + b).astype(o_ref.dtype)


def _layer_norm_flat(x3, gamma, beta, vmem_limit, num_cores, target_bytes):
    bc, n_feats, t = x3.shape
    ft = n_feats * t
    x2 = x3.reshape(bc, ft)            # rows are contiguous in HBM: free reshape
    itemsize = x2.dtype.itemsize

    r_block = max(1, target_bytes // (ft * itemsize))
    if num_cores > 1 and bc >= 2 * num_cores:
        r_block = min(r_block, pl.cdiv(bc, 2 * num_cores))
    if r_block >= bc:
        r_block = bc
    else:
        # sublane layout rule: block dim must be a multiple of 8 (or full dim)
        r_block = max(8, (r_block // 8) * 8)
        if r_block >= bc:
            r_block = bc
    grid = (pl.cdiv(bc, r_block),)

    # Tiny resident constants (reduction matrix + pre-expanded affine params).
    mr = (jnp.arange(ft, dtype=jnp.int32)[:, None] % t
          == jnp.arange(t, dtype=jnp.int32)[None, :]).astype(jnp.float32)
    g_flat = jnp.repeat(gamma.astype(jnp.float32), t).reshape(1, ft)
    b_flat = jnp.repeat(beta.astype(jnp.float32), t).reshape(1, ft)

    kernel = functools.partial(_layernorm_flat_kernel, n_feats=n_feats)
    out = pl.pallas_call(
        kernel,
        out_shape=jax.ShapeDtypeStruct((bc, ft), x2.dtype),
        grid_spec=pltpu.PrefetchScalarGridSpec(
            num_scalar_prefetch=0,
            grid=grid,
            in_specs=[
                pl.BlockSpec((r_block, ft), lambda r: (r, 0)),
                pl.BlockSpec((ft, t), lambda r: (0, 0)),   # resident
                pl.BlockSpec((1, ft), lambda r: (0, 0)),   # resident
                pl.BlockSpec((1, ft), lambda r: (0, 0)),   # resident
            ],
            out_specs=pl.BlockSpec((r_block, ft), lambda r: (r, 0)),
        ),
        compiler_params=pltpu.CompilerParams(
            dimension_semantics=("parallel",),
            vmem_limit_bytes=vmem_limit,
        ),
    )(x2, mr, g_flat, b_flat)
    return out.reshape(bc, n_feats, t)


# ---------------------------------------------------------------------------
# Public entry point
# ---------------------------------------------------------------------------
def layer_norm(x, gamma, beta):
    """x: (B, C, F, T) -> (B, C, F, T); LayerNorm over F (dim 2).

    Equivalent to x.transpose(2,3) -> nn.LayerNorm(F) -> transpose(2,3) in
    PyTorch, without materializing any transpose.  Works for f32 or bf16 x
    (statistics always in f32).
    """
    B, C, F, T = x.shape
    bc = B * C
    x3 = x.reshape(bc, F, T)           # merge leading dims: no data movement

    vmem_limit, num_cores = _tpu_target()
    target_bytes = min(4 << 20, vmem_limit // 8)   # ~4 MiB input per grid step

    if T < _LANE:
        out = _layer_norm_flat(x3, gamma, beta, vmem_limit, num_cores,
                               target_bytes)
    else:
        out = _layer_norm_sublane(x3, gamma, beta, vmem_limit, num_cores,
                                  target_bytes)
    return out.reshape(B, C, F, T)


# ---------------------------------------------------------------------------
# Reference + test
# ---------------------------------------------------------------------------
def _reference(x, gamma, beta):
    xt = jnp.transpose(x, (0, 1, 3, 2)).astype(jnp.float32)
    mean = jnp.mean(xt, axis=-1, keepdims=True)
    var = jnp.mean((xt - mean) ** 2, axis=-1, keepdims=True)
    y = (xt - mean) / jnp.sqrt(var + EPS) * gamma + beta
    return jnp.transpose(y, (0, 1, 3, 2)).astype(x.dtype)


if __name__ == "__main__":
    key = jax.random.PRNGKey(0)
    kx, kg, kb, kx2 = jax.random.split(key, 4)

    # Primary shape implied by the module's forward: (B, C, n_feats, T).
    # T=16 < 128 exercises the lane-dense flat path.
    B, C, n_feats, T = 2, 4, 16, 16
    x = jax.random.normal(kx, (B, C, n_feats, T), dtype=jnp.float32)
    gamma = 1.0 + 0.1 * jax.random.normal(kg, (n_feats,), dtype=jnp.float32)
    beta = 0.1 * jax.random.normal(kb, (n_feats,), dtype=jnp.float32)

    y = jax.block_until_ready(layer_norm(x, gamma, beta))
    y_ref = _reference(x, gamma, beta)
    assert y.shape == x.shape
    assert jnp.allclose(y, y_ref, atol=1e-4, rtol=1e-4), "flat-path mismatch"

    # Second small shape (T >= 128) exercises the native sublane-reduce path.
    x2 = jax.random.normal(kx2, (2, 2, n_feats, 256), dtype=jnp.float32)
    y2 = jax.block_until_ready(layer_norm(x2, gamma, beta))
    y2_ref = _reference(x2, gamma, beta)
    assert jnp.allclose(y2, y2_ref, atol=1e-4, rtol=1e-4), "sublane-path mismatch"

    print("KERNEL_OK")
</pallas_src>

<mosaic_0001>
module attributes {stable_mosaic.version = 11 : i64} {
  func.func @_layernorm_flat_kernel(%arg0: i32, %arg1: memref<8x256xf32, #tpu.memory_space<vmem>>, %arg2: memref<256x16xf32, #tpu.memory_space<vmem>>, %arg3: memref<1x256xf32, #tpu.memory_space<vmem>>, %arg4: memref<1x256xf32, #tpu.memory_space<vmem>>, %arg5: memref<8x256xf32, #tpu.memory_space<vmem>>) attributes {dimension_semantics = [#tpu.dimension_semantics<parallel>], iteration_bounds = array<i64: 1>, scalar_prefetch = 0 : i64, scratch_operands = 0 : i64, tpu.core_type = #tpu.core_type<tc>, window_params = [{transform_indices = @transform_0, window_bounds = array<i64: 8, 256>}, {pipeline_mode = #tpu.pipeline_mode<synchronous>, transform_indices = @transform_1, window_bounds = array<i64: 256, 16>}, {pipeline_mode = #tpu.pipeline_mode<synchronous>, transform_indices = @transform_2, window_bounds = array<i64: 1, 256>}, {pipeline_mode = #tpu.pipeline_mode<synchronous>, transform_indices = @transform_3, window_bounds = array<i64: 1, 256>}, {transform_indices = @transform_4, window_bounds = array<i64: 8, 256>}]} {
    %c0 = arith.constant 0 : index
    %c0_0 = arith.constant 0 : index
    %0 = vector.load %arg1[%c0, %c0_0] : memref<8x256xf32, #tpu.memory_space<vmem>>, vector<8x256xf32>
    %c0_1 = arith.constant 0 : index
    %c0_2 = arith.constant 0 : index
    %1 = vector.load %arg2[%c0_1, %c0_2] : memref<256x16xf32, #tpu.memory_space<vmem>>, vector<256x16xf32>
    %cst = arith.constant dense<0.000000e+00> : vector<8x16xf32>
    %2 = tpu.matmul %0, %1, %cst {dimension_numbers = #tpu.dot_dimension_numbers<[1], [0], [0], [1], [0, 0, 1, 1], [], []>, precision = #tpu.contract_precision<fp32>} : vector<8x256xf32>, vector<256x16xf32>, vector<8x16xf32> -> vector<8x16xf32>
    %cst_3 = arith.constant 6.250000e-02 : f32
    %3 = vector.broadcast %cst_3 : f32 to vector<8x16xf32>
    %4 = arith.mulf %2, %3 : vector<8x16xf32>
    %5 = tpu.concatenate %4, %4, %4, %4, %4, %4, %4, %4, %4, %4, %4, %4, %4, %4, %4, %4 in 1 : vector<8x16xf32>, vector<8x16xf32>, vector<8x16xf32>, vector<8x16xf32>, vector<8x16xf32>, vector<8x16xf32>, vector<8x16xf32>, vector<8x16xf32>, vector<8x16xf32>, vector<8x16xf32>, vector<8x16xf32>, vector<8x16xf32>, vector<8x16xf32>, vector<8x16xf32>, vector<8x16xf32>, vector<8x16xf32> -> vector<8x256xf32>
    %6 = arith.subf %0, %5 : vector<8x256xf32>
    %7 = arith.mulf %6, %6 : vector<8x256xf32>
    %cst_4 = arith.constant dense<0.000000e+00> : vector<8x16xf32>
    %8 = tpu.matmul %7, %1, %cst_4 {dimension_numbers = #tpu.dot_dimension_numbers<[1], [0], [0], [1], [0, 0, 1, 1], [], []>, precision = #tpu.contract_precision<fp32>} : vector<8x256xf32>, vector<256x16xf32>, vector<8x16xf32> -> vector<8x16xf32>
    %cst_5 = arith.constant 6.250000e-02 : f32
    %9 = vector.broadcast %cst_5 : f32 to vector<8x16xf32>
    %10 = arith.mulf %8, %9 : vector<8x16xf32>
    %cst_6 = arith.constant 9.99999974E-6 : f32
    %11 = vector.broadcast %cst_6 : f32 to vector<8x16xf32>
    %12 = arith.addf %10, %11 : vector<8x16xf32>
    %13 = math.rsqrt %12 : vector<8x16xf32>
    %14 = tpu.concatenate %13, %13, %13, %13, %13, %13, %13, %13, %13, %13, %13, %13, %13, %13, %13, %13 in 1 : vector<8x16xf32>, vector<8x16xf32>, vector<8x16xf32>, vector<8x16xf32>, vector<8x16xf32>, vector<8x16xf32>, vector<8x16xf32>, vector<8x16xf32>, vector<8x16xf32>, vector<8x16xf32>, vector<8x16xf32>, vector<8x16xf32>, vector<8x16xf32>, vector<8x16xf32>, vector<8x16xf32>, vector<8x16xf32> -> vector<8x256xf32>
    %c0_7 = arith.constant 0 : index
    %c0_8 = arith.constant 0 : index
    %15 = vector.load %arg3[%c0_7, %c0_8] : memref<1x256xf32, #tpu.memory_space<vmem>>, vector<1x256xf32>
    %c0_9 = arith.constant 0 : index
    %c0_10 = arith.constant 0 : index
    %16 = vector.load %arg4[%c0_9, %c0_10] : memref<1x256xf32, #tpu.memory_space<vmem>>, vector<1x256xf32>
    %17 = arith.mulf %6, %14 : vector<8x256xf32>
    %18 = vector.broadcast %15 : vector<1x256xf32> to vector<8x256xf32>
    %19 = arith.mulf %17, %18 : vector<8x256xf32>
    %20 = vector.broadcast %16 : vector<1x256xf32> to vector<8x256xf32>
    %21 = arith.addf %19, %20 : vector<8x256xf32>
    %c0_11 = arith.constant 0 : index
    %c0_12 = arith.constant 0 : index
    %22 = vector.load %arg5[%c0_11, %c0_12] : memref<8x256xf32, #tpu.memory_space<vmem>>, vector<8x256xf32>
    tpu.vector_store %arg5[%c0_11, %c0_12], %21 {strides = array<i32>} : memref<8x256xf32, #tpu.memory_space<vmem>>, vector<8x256xf32>,
    return
  }
  func.func @transform_0(%arg0: i32) -> (i32, i32) {
    %c0_i32 = arith.constant 0 : i32
    %c0_i32_0 = arith.constant 0 : i32
    return %arg0, %c0_i32 : i32, i32
  }
  func.func @transform_1(%arg0: i32) -> (i32, i32) {
    %c0_i32 = arith.constant 0 : i32
    %c0_i32_0 = arith.constant 0 : i32
    %c0_i32_1 = arith.constant 0 : i32
    return %c0_i32, %c0_i32_0 : i32, i32
  }
  func.func @transform_2(%arg0: i32) -> (i32, i32) {
    %c0_i32 = arith.constant 0 : i32
    %c0_i32_0 = arith.constant 0 : i32
    %c0_i32_1 = arith.constant 0 : i32
    return %c0_i32, %c0_i32_0 : i32, i32
  }
  func.func @transform_3(%arg0: i32) -> (i32, i32) {
    %c0_i32 = arith.constant 0 : i32
    %c0_i32_0 = arith.constant 0 : i32
    %c0_i32_1 = arith.constant 0 : i32
    return %c0_i32, %c0_i32_0 : i32, i32
  }
  func.func @transform_4(%arg0: i32) -> (i32, i32) {
    %c0_i32 = arith.constant 0 : i32
    %c0_i32_0 = arith.constant 0 : i32
    return %arg0, %c0_i32 : i32, i32
  }
}

</mosaic_0001>

<bundles_post_ra>
// kernel: tpu_custom_call.1
= control target key start
LH: loop header
LB: loop body
LE: loop exit
PB: predicated region body
PF: predicated region fallthrough
CT: control target
= control target key end

     0   :  { %s3766_s0 = inlined_call_operand.vmem [shape: f32[8,256], index: 0, kind: input, shape index: {}]   ;;  %s3767_s1 = inlined_call_operand.vmem [shape: f32[256,16], index: 1, kind: input, shape index: {}]   ;;  %s3768_s2 = inlined_call_operand.vmem [shape: f32[1,256], index: 2, kind: input, shape index: {}]   ;;  %s3769_s3 = inlined_call_operand.vmem [shape: f32[1,256], index: 3, kind: input, shape index: {}]   ;;  %s3770_s4 = inlined_call_operand.hbm [shape: f32[8,256], index: 4, kind: output, shape index: {}]  }
   0x1   :  { %v36_v0 = vld [vmem:[%s3767_s1 + $0x80] sm:$0xff]  ;;  %v37_v1 = vld [vmem:[%s3767_s1 + $0x88] sm:$0xff]  ;;  %v38_v7 = vld [vmem:[%s3767_s1 + $0x90] sm:$0xff] }
   0x2   :  { %v20_v2 = vld [vmem:[%s3767_s1] sm:$0xff]  ;;  %v101_v3 = vand.u32 4294901760, %v36_v0  ;;  %v104_v4 = vand.u32 4294901760, %v37_v1  ;;  %v21_v5 = vld [vmem:[%s3767_s1 + $0x8] sm:$0xff]  ;;  %v39_v8 = vld [vmem:[%s3767_s1 + $0x98] sm:$0xff]  ;;  %v107_v10 = vand.u32 4294901760, %v38_v7 }
   0x3   :  { %v53_v6 = vand.u32 4294901760, %v20_v2  ;;  %v56_v9 = vand.u32 4294901760, %v21_v5  ;;  %v110_v11 = vand.u32 4294901760, %v39_v8  ;;  %v22_v12 = vld [vmem:[%s3767_s1 + $0x10] sm:$0xff]  ;;  %v23_v13 = vld [vmem:[%s3767_s1 + $0x18] sm:$0xff]  ;;  %v2793_v14 = vld [vmem:[%s3767_s1 + $0xa0] sm:$0xff] }
   0x4   :  { %v2795_v15 = vpack.c.bf16 %v104_v4, %v101_v3  ;;  %v59_v16 = vand.u32 4294901760, %v22_v12  ;;  %v62_v17 = vand.u32 4294901760, %v23_v13  ;;  %v2800_v18 = vld [vmem:[%s3767_s1 + $0xa8] sm:$0xff]  ;;  %v113_v19 = vand.u32 4294901760, %v2793_v14  ;;  %v2806_v20 = vld [vmem:[%s3767_s1 + $0x20] sm:$0xff]  ;;  %v2823_v26 = vld [vmem:[%s3767_s1 + $0xb0] sm:$0xff] }
   0x5   :  { %v2811_v21 = vld [vmem:[%s3767_s1 + $0x28] sm:$0xff]  ;;  %v2813_v22 = vpack.c.bf16 %v56_v9, %v53_v6  ;;  %v2815_v23 = vpack.c.bf16 %v110_v11, %v107_v10  ;;  %v116_v24 = vand.u32 4294901760, %v2800_v18  ;;  %v2818_v25 = vsub.f32 %v36_v0, %v101_v3  ;;  %v2828_v27 = vld [vmem:[%s3767_s1 + $0xb8] sm:$0xff]  ;;  %v2852_v36 = vld [vmem:[%s3767_s1 + $0x30] sm:$0xff] }
   0x6   :  { %2316 = vmatprep.subr.bf16.mxu0 %v2795_v15  ;;  %v2831_v28 = vpack.c.bf16 %v62_v17, %v59_v16  ;;  %v2833_v29 = vsub.f32 %v37_v1, %v104_v4  ;;  %v65_v30 = vand.u32 4294901760, %v2806_v20  ;;  %v68_v31 = vand.u32 4294901760, %v2811_v21  ;;  %v2874_v45 = vld [vmem:[%s3767_s1 + $0x38] sm:$0xff]  ;;  %v2904_v58 = vld [vmem:[%s3767_s1 + $0xc0] sm:$0xff] }
   0x7   :  { %2318 = vmatpush3.bf16.msra.mxu0 %v2813_v22  ;;  %v2842_v32 = vpack.c.bf16 %v116_v24, %v113_v19  ;;  %v3784_v33 = vand.u32 4294901760, %v2818_v25  ;;  %v2845_v34 = vsub.f32 %v20_v2, %v53_v6  ;;  %v2847_v35 = vsub.f32 %v21_v5, %v56_v9 }
   0x8   :  { %2320 = vmatprep.subr.bf16.mxu0 %v2815_v23  ;;  %v3783_v37 = vand.u32 4294901760, %v2833_v29  ;;  %v2860_v38 = vpack.c.bf16 %v68_v31, %v65_v30  ;;  %v119_v39 = vand.u32 4294901760, %v2823_v26  ;;  %v122_v40 = vand.u32 4294901760, %v2828_v27 }
   0x9   :  { %v280_v41 = vsub.f32 %v2818_v25, %v3784_v33  ;;  %v3780_v42 = vand.u32 4294901760, %v2845_v34  ;;  %v3779_v43 = vand.u32 4294901760, %v2847_v35  ;;  %v2869_v44 = vsub.f32 %v38_v7, %v107_v10 }
   0xa   :  { %v287_v46 = vsub.f32 %v2833_v29, %v3783_v37  ;;  %v2883_v47 = vpack.c.bf16 %v122_v40, %v119_v39  ;;  %v2885_v48 = vsub.f32 %v39_v8, %v110_v11  ;;  %v71_v49 = vand.u32 4294901760, %v2852_v36 }
   0xb   :  { %2322 = vmatpush3.bf16.msra.mxu0 %v2831_v28  ;;  %v281_v50 = vand.u32 4294901760, %v280_v41  ;;  %v168_v51 = vsub.f32 %v2845_v34, %v3780_v42  ;;  %v175_v52 = vsub.f32 %v2847_v35, %v3779_v43  ;;  %v3778_v53 = vand.u32 4294901760, %v2869_v44 }
   0xc   :  { %2324 = vmatprep.subr.bf16.mxu0 %v2842_v32  ;;  %v288_v54 = vand.u32 4294901760, %v287_v46  ;;  %v3777_v55 = vand.u32 4294901760, %v2885_v48  ;;  %v74_v56 = vand.u32 4294901760, %v2874_v45  ;;  %v2899_v57 = vsub.f32 %v22_v12, %v59_v16 }
   0xd   :  { %9 = vsyncpa [#allocation3], 0  ;;  %v169_v59 = vand.u32 4294901760, %v168_v51  ;;  %v176_v60 = vand.u32 4294901760, %v175_v52  ;;  %v294_v61 = vsub.f32 %v2869_v44, %v3778_v53  ;;  %v2909_v62 = vsub.f32 %v23_v13, %v62_v17  ;;  %v2914_v63 = vld [vmem:[%s3767_s1 + $0xc8] sm:$0xff]  ;;  %v2931_v4 = vld [vmem:[%s3767_s1 + $0x40] sm:$0xff] }
   0xe   :  { %v2916_v0 = vpack.c.bf16 %v288_v54, %v281_v50  ;;  %v301_v1 = vsub.f32 %v2885_v48, %v3777_v55  ;;  %v2925_v2 = vpack.c.bf16 %v74_v56, %v71_v49  ;;  %v3774_v3 = vand.u32 4294901760, %v2899_v57  ;;  %v2936_v5 = vld [vmem:[%s3767_s1 + $0x48] sm:$0xff]  ;;  %s2734_s30 = smov 16   ;;  %s2735_s5 = smov 64  }
   0xf   :  { %2326 = vmatpush3.bf16.msra.mxu0 %v2860_v38  ;;  %v2939_v6 = vpack.c.bf16 %v176_v60, %v169_v59  ;;  %v295_v7 = vand.u32 4294901760, %v294_v61  ;;  %v3773_v8 = vand.u32 4294901760, %v2909_v62  ;;  %v125_v9 = vand.u32 4294901760, %v2904_v58  ;;  %s2736_s6 = smov 32   ;;  %s2737_s7 = smov 96  }
  0x10   :  { %3839 = vst [vmem:[#allocation5_spill] sm:$0xff] %v2916_v0  ;;  %2348 = vmatprep.subr.bf16.mxu1 %v2916_v0  ;;  %2328 = vmatprep.subr.bf16.mxu0 %v2883_v47  ;;  %v302_v10 = vand.u32 4294901760, %v301_v1  ;;  %v182_v11 = vsub.f32 %v2899_v57, %v3774_v3  ;;  %v128_v12 = vand.u32 4294901760, %v2914_v63  ;;  %v2952_v13 = vsub.f32 %v2793_v14, %v113_v19  ;;  %v2968_v14 = vld [vmem:[%s3767_s1 + $0xd0] sm:$0xff]  ;;  %v2973_v19 = vld [vmem:[%s3767_s1 + $0xd8] sm:$0xff]  ;;  %s2738_s8 = smov 80  }
  0x11   :  { %3840 = vst [vmem:[#allocation6_spill] sm:$0xff] %v2939_v6  ;;  %2350 = vmatpush3.bf16.msra.mxu1 %v2939_v6  ;;  %v189_v16 = vsub.f32 %v2909_v62, %v3773_v8  ;;  %v2961_v17 = vsub.f32 %v2800_v18, %v116_v24  ;;  %v77_v41 = vand.u32 4294901760, %v2931_v4  ;;  %v80_v46 = vand.u32 4294901760, %v2936_v5  ;;  %s2739_s9 = smov 112   ;;  %s2740_s14 = smov [#allocation2]  }
  0x12   :  { %v2975_v50 = vpack.c.bf16 %v302_v10, %v295_v7  ;;  %v183_v51 = vand.u32 4294901760, %v182_v11  ;;  %v2981_v18 = vpack.c.bf16 %v128_v12, %v125_v9  ;;  %v3771_v24 = vand.u32 4294901760, %v2952_v13  ;;  %s1887_s15 = sshll.u32 %s2740_s14, 4  ;;  %s1888_s15 = int_to_ptr.vmem [resolvable:$true] %s1887_s15 }
  0x13   :  { %2330 = vmatpush3.bf16.msra.mxu0 %v2925_v2  ;;  %v190_v52 = vand.u32 4294901760, %v189_v16  ;;  %v3772_v54 = vand.u32 4294901760, %v2961_v17  ;;  %v2990_v59 = vpack.c.bf16 %v80_v46, %v77_v41  ;;  %v2995_v60 = vsub.f32 %v2806_v20, %v65_v30  ;;  %v3012_v20 = vld [vmem:[%s3767_s1 + $0x50] sm:$0xff]  ;;  %p2714_p1 = scmp.lt.s32.totalorder %s1888_s15, %s1888_s15 }
  0x14   :  { %3841 = vst [vmem:[#allocation7_spill] sm:$0xff] %v2975_v50  ;;  %2352 = vmatprep.subr.bf16.mxu1 %v2975_v50  ;;  %2332 = vmatprep.subr.bf16.mxu0 %v2981_v18  ;;  %v308_v61 = vsub.f32 %v2952_v13, %v3771_v24  ;;  %v3005_v1 = vsub.f32 %v2811_v21, %v68_v31  ;;  %v3795_v7 = vand.u32 4294901760, %v2968_v14  ;;  %v3791_v10 = vand.u32 4294901760, %v2973_v19  ;;  %v3028_v31 = vld [vmem:[%s3767_s1 + $0x58] sm:$0xff] }
  0x15   :  { %v3014_v30 = vpack.c.bf16 %v190_v52, %v183_v51  ;;  %v315_v11 = vsub.f32 %v2961_v17, %v3772_v54  ;;  %v3775_v16 = vand.u32 4294901760, %v2995_v60  ;;  %v3023_v21 = vsub.f32 %v2823_v26, %v119_v39 }
  0x16   :  { %v309_v24 = vand.u32 4294901760, %v308_v61  ;;  %v3776_v51 = vand.u32 4294901760, %v3005_v1  ;;  %v3035_v52 = vpack.c.bf16 %v3791_v10, %v3795_v7  ;;  %v3040_v54 = vsub.f32 %v2828_v27, %v122_v40 }
  0x17   :  { %3842 = vst [vmem:[#allocation8_spill] sm:$0xff] %v3014_v30  ;;  %2354 = vmatpush3.bf16.msra.mxu1 %v3014_v30  ;;  %v316_v26 = vand.u32 4294901760, %v315_v11  ;;  %2334 = vmatpush3.bf16.msra.mxu0 %v2990_v59  ;;  %v196_v39 = vsub.f32 %v2995_v60, %v3775_v16  ;;  %v3782_v61 = vand.u32 4294901760, %v3023_v21  ;;  %v3786_v8 = vand.u32 4294901760, %v3012_v20  ;;  %v3063_v16 = vld [vmem:[%s3767_s1 + $0xe0] sm:$0xff] }
  0x18   :  { %v203_v3 = vsub.f32 %v3005_v1, %v3776_v51  ;;  %2336 = vmatprep.subr.bf16.mxu0 %v3035_v52  ;;  %v3781_v27 = vand.u32 4294901760, %v3040_v54  ;;  %v3785_v40 = vand.u32 4294901760, %v3028_v31  ;;  %v3058_v11 = vsub.f32 %v2852_v36, %v71_v49  ;;  %v3068_v51 = vld [vmem:[%s3767_s1 + $0xe8] sm:$0xff] }
  0x19   :  { %v3070_v55 = vpack.c.bf16 %v316_v26, %v309_v24  ;;  %v197_v53 = vand.u32 4294901760, %v196_v39  ;;  %v322_v43 = vsub.f32 %v3023_v21, %v3782_v61  ;;  %v3078_v36 = vsub.f32 %v2874_v45, %v74_v56  ;;  %v3093_v39 = vld [vmem:[%s3767_s1 + $0x60] sm:$0xff]  ;;  %v3102_v61 = vld [vmem:[%s3767_s1 + $0x68] sm:$0xff] }
  0x1a   :  { %v204_v49 = vand.u32 4294901760, %v203_v3  ;;  %v329_v42 = vsub.f32 %v3040_v54, %v3781_v27  ;;  %v3087_v24 = vpack.c.bf16 %v3785_v40, %v3786_v8  ;;  %v3788_v26 = vand.u32 4294901760, %v3058_v11 }
  0x1b   :  { %3843 = vst [vmem:[#allocation9_spill] sm:$0xff] %v3070_v55  ;;  %2356 = vmatprep.subr.bf16.mxu1 %v3070_v55  ;;  %v323_v45 = vand.u32 4294901760, %v322_v43  ;;  %v3787_v56 = vand.u32 4294901760, %v3078_v36  ;;  %v3790_v3 = vand.u32 4294901760, %v3063_v16  ;;  %v3789_v27 = vand.u32 4294901760, %v3068_v51 }
  0x1c   :  { %v3104_v37 = vpack.c.bf16 %v204_v49, %v197_v53  ;;  %v330_v33 = vand.u32 4294901760, %v329_v42  ;;  %2338 = vmatpush3.bf16.msra.mxu0 %v3087_v24  ;;  %v210_v43 = vsub.f32 %v3058_v11, %v3788_v26  ;;  %v3113_v40 = vsub.f32 %v2904_v58, %v125_v9  ;;  %v3133_v58 = vld [vmem:[%s3767_s1 + $0xf0] sm:$0xff]  ;;  %v3138_v9 = vld [vmem:[%s3767_s1 + $0xf8] sm:$0xff] }
  0x1d   :  { %v217_v8 = vsub.f32 %v3078_v36, %v3787_v56  ;;  %v3122_v42 = vpack.c.bf16 %v3789_v27, %v3790_v3  ;;  %v3127_v53 = vsub.f32 %v2914_v63, %v128_v12  ;;  %v3794_v49 = vand.u32 4294901760, %v3093_v39 }
  0x1e   :  { %3844 = vst [vmem:[#allocation10_spill] sm:$0xff] %v3104_v37  ;;  %2358 = vmatpush3.bf16.msra.mxu1 %v3104_v37  ;;  %v3141_v56 = vpack.c.bf16 %v330_v33, %v323_v45  ;;  %v211_v26 = vand.u32 4294901760, %v210_v43  ;;  %v3792_v63 = vand.u32 4294901760, %v3113_v40  ;;  %v3793_v12 = vand.u32 4294901760, %v3102_v61 }
  0x1f   :  { %3845 = vst [vmem:[#allocation11_spill] sm:$0xff] %v3122_v42  ;;  %v218_v27 = vand.u32 4294901760, %v217_v8  ;;  %2340 = vmatprep.subr.bf16.mxu0 %v3122_v42  ;;  %v3796_v3 = vand.u32 4294901760, %v3127_v53  ;;  %v3150_v10 = vsub.f32 %v2931_v4, %v77_v41  ;;  %v3155_v33 = vsub.f32 %v2936_v5, %v80_v46  ;;  %v3172_v5 = vld [vmem:[%s3767_s1 + $0x70] sm:$0xff] }
  0x20   :  { %3846 = vst [vmem:[#allocation12_spill] sm:$0xff] %v3141_v56  ;;  %2360 = vmatprep.subr.bf16.mxu1 %v3141_v56  ;;  %v336_v8 = vsub.f32 %v3113_v40, %v3792_v63  ;;  %v3165_v45 = vpack.c.bf16 %v3793_v12, %v3794_v49  ;;  %v3800_v4 = vand.u32 4294901760, %v3133_v58  ;;  %v3799_v41 = vand.u32 4294901760, %v3138_v9  ;;  %v3184_v49 = vld [vmem:[%s3767_s1 + $0x78] sm:$0xff] }
  0x21   :  { %v3174_v46 = vpack.c.bf16 %v218_v27, %v211_v26  ;;  %v343_v43 = vsub.f32 %v3127_v53, %v3796_v3  ;;  %v3850_v26 = vand.u32 4294901760, %v2968_v14  ;;  %v3851_v12 = vand.u32 4294901760, %v2973_v19 }
  0x22   :  { %3847 = vst [vmem:[#allocation13_spill] sm:$0xff] %v3165_v45  ;;  %v337_v7 = vand.u32 4294901760, %v336_v8  ;;  %2342 = vmatpush3.bf16.msra.mxu0 %v3165_v45  ;;  %v3191_v27 = vpack.c.bf16 %v3799_v41, %v3800_v4  ;;  %v3852_v56 = vand.u32 4294901760, %v3150_v10  ;;  %v3853_v41 = vand.u32 4294901760, %v3155_v33 }
  0x23   :  { %3848 = vst [vmem:[#allocation14_spill] sm:$0xff] %v3174_v46  ;;  %v3196_v3 = vsub.f32 %v2968_v14, %v3850_v26  ;;  %v3201_v63 = vsub.f32 %v2973_v19, %v3851_v12  ;;  %2362 = vmatpush3.bf16.msra.mxu1 %v3174_v46  ;;  %v344_v8 = vand.u32 4294901760, %v343_v43  ;;  %v98_v12 = vand.u32 4294901760, %v3184_v49 }
  0x24   :  { %3849 = vst [vmem:[#allocation15_spill] sm:$0xff] %v3191_v27  ;;  %v224_v37 = vsub.f32 %v3150_v10, %v3852_v56  ;;  %v231_v4 = vsub.f32 %v3155_v33, %v3853_v41  ;;  %2344 = vmatprep.subr.bf16.mxu0 %v3191_v27  ;;  %v3854_v43 = vand.u32 4294901760, %v3012_v20  ;;  %v3223_v56 = vld [vmem:[%s3766_s0 + $0x8] sm:$0xff]  ;;  %v3857_v14 = vand.u32 4294901760, %v3028_v31 }
  0x25   :  { %3855 = vst [vmem:[#allocation16_spill] sm:$0xff] %v3223_v56  ;;  %v3225_v41 = vpack.c.bf16 %v344_v8, %v337_v7  ;;  %v3858_v30 = vand.u32 4294901760, %v3196_v3  ;;  %v3860_v6 = vand.u32 4294901760, %v3172_v5  ;;  %v3870_v27 = vand.u32 4294901760, %v3093_v39 }
  0x26   :  { %v3218_v26 = vsub.f32 %v3012_v20, %v3854_v43  ;;  %v225_v55 = vand.u32 4294901760, %v224_v37  ;;  %v232_v46 = vand.u32 4294901760, %v231_v4  ;;  %v3230_v19 = vsub.f32 %v3028_v31, %v3857_v14 }
  0x27   :  { %3856 = vst [vmem:[#allocation17_spill] sm:$0xff] %v3225_v41  ;;  %v350_v50 = vsub.f32 %v3196_v3, %v3858_v30  ;;  %v3859_v20 = vand.u32 4294901760, %v3201_v63  ;;  %v3240_v0 = vpack.c.bf16 %v98_v12, %v3860_v6  ;;  %2364 = vmatprep.subr.bf16.mxu1 %v3225_v41  ;;  %v3248_v4 = vand.u32 4294901760, %v3223_v56  ;;  %v3258_v6 = vld [vmem:[%s3766_s0] sm:$0xff]  ;;  %s2733_s0 = smov 48  }
  0x28   :  { %v3807_v37 = vand.u32 4294901760, %v3218_v26  ;;  %v3244_v7 = vpack.c.bf16 %v232_v46, %v225_v55  ;;  %v3864_v30 = vand.u32 4294901760, %v3063_v16  ;;  %3865 = vst [vmem:[#allocation21_spill] sm:$0xff] %v3258_v6  ;;  %v3866_v46 = vand.u32 4294901760, %v3068_v51 }
  0x29   :  { %v357_v43 = vsub.f32 %v3201_v63, %v3859_v20  ;;  %3861 = vst [vmem:[#allocation18_spill] sm:$0xff] %v3240_v0  ;;  %3863 = vst [vmem:[#allocation20_spill] sm:$0xff] %v3248_v4  ;;  %v351_v14 = vand.u32 4294901760, %v350_v50  ;;  %2346 = vmatpush3.bf16.msra.mxu0 %v3240_v0  ;;  %v3275_v50 = vsub.f32 %v3223_v56, %v3248_v4  ;;  %389 = vmatprep.mubr.f32.mxu1 %v3248_v4  ;;  %vm937_vm0 = vcmask 130048  }
  0x2a   :  { %3862 = vst [vmem:[#allocation19_spill] sm:$0xff] %v3244_v7  ;;  %v3253_v8 = vsub.f32 %v3063_v16, %v3864_v30  ;;  %v238_v55 = vsub.f32 %v3218_v26, %v3807_v37  ;;  %v3267_v31 = vsub.f32 %v3068_v51, %v3866_v46  ;;  %2366 = vmatpush3.bf16.msra.mxu1 %v3244_v7  ;;  %v3867_v16 = vand.u32 4294901760, %v3230_v19 }
  0x2b   :  { %v358_v20 = vand.u32 4294901760, %v357_v43  ;;  %v3280_v37 = vpack.c.bf16 %v2833_v29, %v2818_v25  ;;  %v3287_v41 = vand.u32 4294901760, %v3258_v6  ;;  %v3874_v4 = vand.u32 4294901760, %v3133_v58 }
  0x2c   :  { %v245_v30 = vsub.f32 %v3230_v19, %v3867_v16  ;;  %v3815_v43 = vand.u32 4294901760, %v3253_v8  ;;  %v239_v46 = vand.u32 4294901760, %v238_v55  ;;  %v3820_v7 = vand.u32 4294901760, %v3267_v31 }
  0x2d   :  { %3868 = vst [vmem:[#allocation22_spill] sm:$0xff] %v3280_v37  ;;  %v3283_v51 = vpack.c.bf16 %v358_v20, %v351_v14  ;;  %2380 = vmatprep.subr.bf16.mxu0 %v3280_v37  ;;  %v3297_v14 = vsub.f32 %v3093_v39, %v3870_v27  ;;  %v3305_v55 = vsub.f32 %v3258_v6, %v3287_v41  ;;  %v3873_v39 = vand.u32 4294901760, %v3275_v50 }
  0x2e   :  { %v246_v16 = vand.u32 4294901760, %v245_v30  ;;  %v364_v0 = vsub.f32 %v3253_v8, %v3815_v43  ;;  %v371_v20 = vsub.f32 %v3267_v31, %v3820_v7  ;;  %v3871_v30 = vand.u32 4294901760, %v3102_v61 }
  0x2f   :  { %3869 = vst [vmem:[#allocation23_spill] sm:$0xff] %v3283_v51  ;;  %2368 = vmatprep.subr.bf16.mxu1 %v3283_v51  ;;  %v151_v27 = vsub.f32 %v3275_v50, %v3873_v39  ;;  %v3826_v51 = vand.u32 4294901760, %v3297_v14  ;;  %v3833_v7 = vand.u32 4294901760, %v3305_v55  ;;  %v3323_v42 = vsub.f32 %v3133_v58, %v3874_v4 }
  0x30   :  { %v3310_v43 = vsub.f32 %v3102_v61, %v3871_v30  ;;  %v3312_v56 = vpack.c.bf16 %v246_v16, %v239_v46  ;;  %v365_v37 = vand.u32 4294901760, %v364_v0  ;;  %v372_v45 = vand.u32 4294901760, %v371_v20 }
  0x31   :  { %v152_v61 = vand.u32 4294901760, %v151_v27  ;;  %v252_v46 = vsub.f32 %v3297_v14, %v3826_v51  ;;  %v3331_v0 = vpack.c.bf16 %v2847_v35, %v2845_v34  ;;  %v3876_v16 = vand.u32 4294901760, %v3138_v9 }
  0x32   :  { %3872 = vst [vmem:[#allocation24_spill] sm:$0xff] %v3312_v56  ;;  %v3828_v6 = vand.u32 4294901760, %v3310_v43  ;;  %2370 = vmatpush3.bf16.msra.mxu1 %v3312_v56  ;;  %v3338_v30 = vpack.c.bf16 %v372_v45, %v365_v37  ;;  %v157_v58 = vsub.f32 %v3305_v55, %v3833_v7  ;;  %v3829_v39 = vand.u32 4294901760, %v3323_v42 }
  0x33   :  { %3875 = vst [vmem:[#allocation25_spill] sm:$0xff] %v3331_v0  ;;  %v3336_v20 = vsub.f32 %v3138_v9, %v3876_v16  ;;  %153 = vmatprep.mubr.f32.mxu0 %v152_v61  ;;  %v253_v27 = vand.u32 4294901760, %v252_v46  ;;  %v3877_v56 = vand.u32 4294901760, %v3172_v5  ;;  %v3354_v45 = vsub.f32 %v3184_v49, %v98_v12 }
  0x34   :  { %v259_v4 = vsub.f32 %v3310_v43, %v3828_v6  ;;  %2372 = vmatprep.subr.bf16.mxu1 %v3338_v30  ;;  %v158_v37 = vand.u32 4294901760, %v157_v58  ;;  %v378_v6 = vsub.f32 %v3323_v42, %v3829_v39  ;;  %v3362_v61 = vpack.c.bf16 %v2885_v48, %v2869_v44 }
  0x35   :  { %v3830_v51 = vand.u32 4294901760, %v3336_v20  ;;  %v3351_v9 = vsub.f32 %v3172_v5, %v3877_v56  ;;  %v3831_v49 = vand.u32 4294901760, %v3354_v45  ;;  %v3879_v7 = vand.u32 4294901760, %v2818_v25 }
  0x36   :  { %v260_v16 = vand.u32 4294901760, %v259_v4  ;;  %3878 = vst [vmem:[#allocation26_spill] sm:$0xff] %v3362_v61  ;;  %159 = vmatmul.mubr.f32.vlgmr.msra.gmra.mrb[0].mxu0 %v158_v37  ;;  %v379_v46 = vand.u32 4294901760, %v378_v6  ;;  %v3387_v6 = vpack.c.bf16 %v2961_v17, %v2952_v13  ;;  %v3885_v25 = vand.u32 4294901760, %v2899_v57 }
  0x37   :  { %v385_v5 = vsub.f32 %v3336_v20, %v3830_v51  ;;  %v3832_v56 = vand.u32 4294901760, %v3351_v9  ;;  %2382 = vmatpush3.bf16.msra.mxu0 %v3331_v0  ;;  %v273_v39 = vsub.f32 %v3354_v45, %v3831_v49  ;;  %v3380_v51 = vpack.c.bf16 %v2909_v62, %v2899_v57  ;;  %526 = vmatprep.mubr.f32.mxu0 %v3275_v50 }
  0x38   :  { %v3369_v12 = vpack.c.bf16 %v260_v16, %v253_v27  ;;  %2384 = vmatprep.subr.bf16.mxu0 %v3362_v61  ;;  %v3397_v49 = vpack.c.bf16 %v3040_v54, %v3023_v21  ;;  %v3883_v0 = vand.u32 4294901760, %v2869_v44  ;;  %v3890_v44 = vand.u32 4294901760, %v3005_v1 }
  0x39   :  { %v386_v58 = vand.u32 4294901760, %v385_v5  ;;  %v266_v4 = vsub.f32 %v3351_v9, %v3832_v56  ;;  %v274_v16 = vand.u32 4294901760, %v273_v39  ;;  %v3393_v5 = vpack.c.bf16 %v3005_v1, %v2995_v60 }
  0x3a   :  { %2374 = vmatpush3.bf16.msra.mxu1 %v3369_v12  ;;  %v3881_v39 = vand.u32 4294901760, %v2845_v34  ;;  %v3887_v34 = vand.u32 4294901760, %v2952_v13  ;;  %v3892_v57 = vand.u32 4294901760, %v3040_v54  ;;  %v3893_v13 = vand.u32 4294901760, %v3058_v11 }
  0x3b   :  { %v3389_v27 = vpack.c.bf16 %v386_v58, %v379_v46  ;;  %v267_v37 = vand.u32 4294901760, %v266_v4  ;;  %2386 = vmatpush3.bf16.msra.mxu0 %v3380_v51  ;;  %v3880_v46 = vand.u32 4294901760, %v2833_v29  ;;  %v3882_v4 = vand.u32 4294901760, %v2847_v35 }
  0x3c   :  { %2388 = vmatprep.subr.bf16.mxu0 %v3387_v6  ;;  %v3886_v29 = vand.u32 4294901760, %v2909_v62  ;;  %v3888_v35 = vand.u32 4294901760, %v2961_v17  ;;  %v3894_v17 = vand.u32 4294901760, %v3078_v36  ;;  %v3896_v1 = vand.u32 4294901760, %v3127_v53 }
  0x3d   :  { %2376 = vmatprep.subr.bf16.mxu1 %v3389_v27  ;;  %v3400_v56 = vpack.c.bf16 %v274_v16, %v267_v37  ;;  %v3407_v58 = vpack.c.bf16 %v3880_v46, %v3879_v7  ;;  %v3413_v61 = vpack.c.bf16 %v3882_v4, %v3881_v39  ;;  %v3884_v37 = vand.u32 4294901760, %v2885_v48 }
  0x3e   :  { %v3426_v7 = vpack.c.bf16 %v3886_v29, %v3885_v25  ;;  %v3432_v46 = vpack.c.bf16 %v3888_v35, %v3887_v34  ;;  %v3889_v39 = vand.u32 4294901760, %v2995_v60  ;;  %v3891_v48 = vand.u32 4294901760, %v3023_v21 }
  0x3f   :  { %v3420_v16 = vpack.c.bf16 %v3884_v37, %v3883_v0  ;;  %2378 = vmatpush3.bf16.msra.mxu1 %v3400_v56  ;;  %v3451_v0 = vpack.c.bf16 %v3894_v17, %v3893_v13  ;;  %v3895_v60 = vand.u32 4294901760, %v3113_v40  ;;  %v3897_v25 = vand.u32 4294901760, %v3150_v10  ;;  %2390 = vmatpush3.bf16.msra.mxu0 %v3393_v5  ;;  %v3904_v13 = vld [vmem:[#allocation18_spill] sm:$0xff] }
  0x40   :  { %v3438_v4 = vpack.c.bf16 %v3890_v44, %v3889_v39  ;;  %v3445_v62 = vpack.c.bf16 %v3892_v57, %v3891_v48  ;;  %v3898_v21 = vand.u32 4294901760, %v3155_v33  ;;  %2412 = vmatprep.subr.bf16.mxu1 %v2795_v15  ;;  %v3469_v54 = vpack.c.bf16 %v3078_v36, %v3058_v11  ;;  %2392 = vmatprep.subr.bf16.mxu0 %v3397_v49  ;;  %v3900_v39 = vld [vmem:[#allocation11_spill] sm:$0xff]  ;;  %v3901_v44 = vld [vmem:[#allocation20_spill] sm:$0xff]  ;;  %v3902_v48 = vld [vmem:[#allocation13_spill] sm:$0xff] }
  0x41   :  { %v3457_v37 = vpack.c.bf16 %v3896_v1, %v3895_v60  ;;  %v3475_v34 = vpack.c.bf16 %v3127_v53, %v3113_v40  ;;  %v3899_v35 = vand.u32 4294901760, %v3275_v50  ;;  %v3484_v11 = vpack.c.bf16 %v3155_v33, %v3150_v10  ;;  %v3903_v57 = vld [vmem:[#allocation15_spill] sm:$0xff] }
  0x42   :  { %v3463_v29 = vpack.c.bf16 %v3898_v21, %v3897_v25  ;;  %391 = vmatmul.mubr.f32.vlgmr.msra.gmra.mrb[0].mxu1 %v3287_v41  ;;  %v3489_v36 = vpack.c.bf16 %v3201_v63, %v3196_v3  ;;  %v3496_v40 = vpack.c.bf16 %v3230_v19, %v3218_v26  ;;  %v3501_v10 = vpack.c.bf16 %v3267_v31, %v3253_v8 }
  0x43   :  { %2414 = vmatpush3.bf16.msra.mxu1 %v2813_v22  ;;  %633 = vmatprep.mubr.f32.mxu1 %v3899_v35  ;;  %v3508_v53 = vpack.c.bf16 %v3310_v43, %v3297_v14  ;;  %v3513_v33 = vpack.c.bf16 %v3336_v20, %v3323_v42  ;;  %v3520_v50 = vpack.c.bf16 %v3354_v45, %v3351_v9  ;;  %v3905_v17 = vand.u32 4294901760, %v3305_v55 }
  0x44   :  { %2416 = vmatprep.subr.bf16.mxu1 %v2815_v23  ;;  %2394 = vmatpush3.bf16.msra.mxu0 %v3469_v54  ;;  %v3906_v60 = vand.u32 4294901760, %v3196_v3  ;;  %v3907_v1 = vand.u32 4294901760, %v3201_v63  ;;  %v3909_v21 = vand.u32 4294901760, %v3230_v19  ;;  %v3910_v3 = vand.u32 4294901760, %v3253_v8 }
  0x45   :  { %2396 = vmatprep.subr.bf16.mxu0 %v3475_v34  ;;  %v3911_v63 = vand.u32 4294901760, %v3267_v31  ;;  %v3913_v19 = vand.u32 4294901760, %v3310_v43  ;;  %v3915_v8 = vand.u32 4294901760, %v3323_v42  ;;  %v3916_v31 = vand.u32 4294901760, %v3336_v20  ;;  %v3921_v42 = vld [vmem:[#allocation5_spill] sm:$0xff]  ;;  %v3922_v20 = vld [vmem:[#allocation6_spill] sm:$0xff] }
  0x46   :  { %v3552_v25 = vpack.c.bf16 %v3907_v1, %v3906_v60  ;;  %v3919_v43 = vand.u32 4294901760, %v3354_v45  ;;  %v3924_v45 = vld [vmem:[#allocation8_spill] sm:$0xff]  ;;  %vm939_vm1 = vcmask 261120   ;;  %vm941_vm2 = vcmask 392192  }
  0x47   :  { %2418 = vmatpush3.bf16.msra.mxu1 %v2831_v28  ;;  %v3584_v60 = vpack.c.bf16 %v3916_v31, %v3915_v8  ;;  %v3932_v8 = vld [vmem:[#allocation22_spill] sm:$0xff]  ;;  %v3933_v31 = vld [vmem:[#allocation24_spill] sm:$0xff]  ;;  %vm943_vm3 = vcmask 523264   ;;  %vm945_vm4 = vcmask 654336   ;;  %vm947_vm5 = vcmask 785408  }
  0x48   :  { %2420 = vmatprep.subr.bf16.mxu1 %v2842_v32  ;;  %2398 = vmatpush3.bf16.msra.mxu0 %v3484_v11  ;;  %vm949_vm6 = vcmask 916480  }
  0x49   :  { %2400 = vmatprep.subr.bf16.mxu0 %v3489_v36  ;;  %3917 = vst [vmem:[#allocation20_spill] sm:$0xff] %v3584_v60 }
  0x4b   :  { %2422 = vmatpush3.bf16.msra.mxu1 %v2860_v38 }
  0x4c   :  { %2424 = vmatprep.subr.bf16.mxu1 %v2883_v47  ;;  %2402 = vmatpush3.bf16.msra.mxu0 %v3496_v40 }
  0x4d   :  { %2404 = vmatprep.subr.bf16.mxu0 %v3501_v10 }
  0x4f   :  { %2426 = vmatpush3.bf16.msra.mxu1 %v2925_v2 }
  0x50   :  { %2428 = vmatprep.subr.bf16.mxu1 %v2981_v18  ;;  %2406 = vmatpush3.bf16.msra.mxu0 %v3508_v53 }
  0x51   :  { %2408 = vmatprep.subr.bf16.mxu0 %v3513_v33 }
  0x53   :  { %2430 = vmatpush3.bf16.msra.mxu1 %v2990_v59 }
  0x54   :  { %2432 = vmatprep.subr.bf16.mxu1 %v3035_v52  ;;  %2410 = vmatpush3.bf16.msra.mxu0 %v3520_v50 }
  0x55   :  { %2444 = vmatprep.subr.bf16.mxu0 %v3407_v58 }
  0x57   :  { %2434 = vmatpush3.bf16.msra.mxu1 %v3087_v24  ;;  %529 = vmatmul.mubr.f32.vlgmr.msra.gmra.mrb[2].mxu0 %v3305_v55  ;;  %v3908_v55 = vand.u32 4294901760, %v3218_v26  ;;  %v3912_v26 = vand.u32 4294901760, %v3297_v14  ;;  %v3918_v14 = vand.u32 4294901760, %v3351_v9  ;;  %v3923_v9 = vld [vmem:[#allocation7_spill] sm:$0xff] }
  0x58   :  { %2436 = vmatprep.subr.bf16.mxu1 %v3900_v39  ;;  %2446 = vmatpush3.bf16.msra.mxu0 %v3413_v61 }
  0x59   :  { %803 = vmatprep.mubr.f32.mxu0 %v3901_v44  ;;  %2448 = vmatprep.subr.bf16.mxu0 %v3420_v16  ;;  %v3561_v35 = vpack.c.bf16 %v3909_v21, %v3908_v55  ;;  %v3593_v1 = vpack.c.bf16 %v3919_v43, %v3918_v14  ;;  %v3925_v55 = vld [vmem:[#allocation9_spill] sm:$0xff]  ;;  %v3926_v21 = vld [vmem:[#allocation10_spill] sm:$0xff] }
  0x5b   :  { %2438 = vmatpush3.bf16.msra.mxu1 %v3902_v48  ;;  %3920 = vst [vmem:[#allocation13_spill] sm:$0xff] %v3593_v1 }
  0x5c   :  { %2440 = vmatprep.subr.bf16.mxu1 %v3903_v57  ;;  %2450 = vmatpush3.bf16.msra.mxu0 %v3426_v7 }
  0x5d   :  { %2452 = vmatprep.subr.bf16.mxu0 %v3432_v46 }
  0x5f   :  { %2442 = vmatpush3.bf16.msra.mxu1 %v3904_v13 }
  0x60   :  { %2476 = vmatprep.subr.bf16.mxu1 %v2795_v15  ;;  %2454 = vmatpush3.bf16.msra.mxu0 %v3438_v4 }
  0x61   :  { %2456 = vmatprep.subr.bf16.mxu0 %v3445_v62 }
  0x62   :  { %637 = vmatmul.mubr.f32.vlgmr.msra.gmra.mrb[2].mxu1 %v3905_v17  ;;  %v3577_v17 = vpack.c.bf16 %v3913_v19, %v3912_v26  ;;  %v3930_v26 = vld [vmem:[#allocation19_spill] sm:$0xff] }
  0x63   :  { %2478 = vmatpush3.bf16.msra.mxu1 %v2813_v22  ;;  %907 = vmatprep.mubr.f32.mxu1 %v3901_v44  ;;  %v3568_v44 = vpack.c.bf16 %v3911_v63, %v3910_v3  ;;  %v3928_v3 = vld [vmem:[#allocation14_spill] sm:$0xff]  ;;  %v3929_v63 = vld [vmem:[#allocation17_spill] sm:$0xff]  ;;  %v3931_v19 = vld [vmem:[#allocation23_spill] sm:$0xff] }
  0x64   :  { %2480 = vmatprep.subr.bf16.mxu1 %v2815_v23  ;;  %2458 = vmatpush3.bf16.msra.mxu0 %v3451_v0  ;;  %3914 = vst [vmem:[#allocation11_spill] sm:$0xff] %v3577_v17 }
  0x65   :  { %2460 = vmatprep.subr.bf16.mxu0 %v3457_v37 }
  0x67   :  { %2482 = vmatpush3.bf16.msra.mxu1 %v2831_v28 }
  0x68   :  { %2484 = vmatprep.subr.bf16.mxu1 %v2842_v32  ;;  %2462 = vmatpush3.bf16.msra.mxu0 %v3463_v29 }
  0x69   :  { %2464 = vmatprep.subr.bf16.mxu0 %v3552_v25 }
  0x6b   :  { %2486 = vmatpush3.bf16.msra.mxu1 %v2860_v38 }
  0x6c   :  { %2488 = vmatprep.subr.bf16.mxu1 %v2883_v47  ;;  %2466 = vmatpush3.bf16.msra.mxu0 %v3561_v35 }
  0x6d   :  { %2468 = vmatprep.subr.bf16.mxu0 %v3568_v44 }
  0x6f   :  { %2490 = vmatpush3.bf16.msra.mxu1 %v2925_v2 }
  0x70   :  { %2492 = vmatprep.subr.bf16.mxu1 %v2981_v18  ;;  %2470 = vmatpush3.bf16.msra.mxu0 %v3577_v17 }
  0x71   :  { %2472 = vmatprep.subr.bf16.mxu0 %v3584_v60 }
  0x73   :  { %2494 = vmatpush3.bf16.msra.mxu1 %v2990_v59 }
  0x74   :  { %2496 = vmatprep.subr.bf16.mxu1 %v3035_v52  ;;  %2474 = vmatpush3.bf16.msra.mxu0 %v3593_v1 }
  0x75   :  { %2508 = vmatprep.subr.bf16.mxu0 %v2795_v15 }
  0x77   :  { %2498 = vmatpush3.bf16.msra.mxu1 %v3087_v24  ;;  %805 = vmatmul.mubr.f32.vlgmr.msra.gmra.mrb[4].mxu0 %v3287_v41 }
  0x78   :  { %2500 = vmatprep.subr.bf16.mxu1 %v3900_v39  ;;  %2510 = vmatpush3.bf16.msra.mxu0 %v2813_v22 }
  0x79   :  { %2512 = vmatprep.subr.bf16.mxu0 %v2815_v23 }
  0x7b   :  { %2502 = vmatpush3.bf16.msra.mxu1 %v3902_v48 }
  0x7c   :  { %2504 = vmatprep.subr.bf16.mxu1 %v3903_v57  ;;  %2514 = vmatpush3.bf16.msra.mxu0 %v2831_v28 }
  0x7d   :  { %2516 = vmatprep.subr.bf16.mxu0 %v2842_v32 }
  0x7f   :  { %2506 = vmatpush3.bf16.msra.mxu1 %v3904_v13 }
  0x80   :  { %2540 = vmatprep.subr.bf16.mxu1 %v3921_v42  ;;  %2518 = vmatpush3.bf16.msra.mxu0 %v2860_v38 }
  0x81   :  { %2520 = vmatprep.subr.bf16.mxu0 %v2883_v47 }
  0x82   :  { %909 = vmatmul.mubr.f32.vlgmr.msra.gmra.mrb[4].mxu1 %v3287_v41  ;;  %v3927_v41 = vld [vmem:[#allocation12_spill] sm:$0xff] }
  0x83   :  { %2542 = vmatpush3.bf16.msra.mxu1 %v3922_v20 }
  0x84   :  { %2544 = vmatprep.subr.bf16.mxu1 %v3923_v9  ;;  %2522 = vmatpush3.bf16.msra.mxu0 %v2925_v2 }
  0x85   :  { %2524 = vmatprep.subr.bf16.mxu0 %v2981_v18 }
  0x87   :  { %2546 = vmatpush3.bf16.msra.mxu1 %v3924_v45 }
  0x88   :  { %2548 = vmatprep.subr.bf16.mxu1 %v3925_v55  ;;  %2526 = vmatpush3.bf16.msra.mxu0 %v2990_v59 }
  0x89   :  { %2528 = vmatprep.subr.bf16.mxu0 %v3035_v52 }
  0x8b   :  { %2550 = vmatpush3.bf16.msra.mxu1 %v3926_v21 }
  0x8c   :  { %2552 = vmatprep.subr.bf16.mxu1 %v3927_v41  ;;  %2530 = vmatpush3.bf16.msra.mxu0 %v3087_v24 }
  0x8d   :  { %2532 = vmatprep.subr.bf16.mxu0 %v3900_v39 }
  0x8f   :  { %2554 = vmatpush3.bf16.msra.mxu1 %v3928_v3 }
  0x90   :  { %2556 = vmatprep.subr.bf16.mxu1 %v3929_v63  ;;  %2534 = vmatpush3.bf16.msra.mxu0 %v3902_v48 }
  0x91   :  { %2536 = vmatprep.subr.bf16.mxu0 %v3903_v57 }
  0x93   :  { %2558 = vmatpush3.bf16.msra.mxu1 %v3930_v26 }
  0x94   :  { %2560 = vmatprep.subr.bf16.mxu1 %v3931_v19  ;;  %2538 = vmatpush3.bf16.msra.mxu0 %v3904_v13 }
  0x95   :  { %2572 = vmatprep.subr.bf16.mxu0 %v3932_v8 }
  0x97   :  { %2562 = vmatpush3.bf16.msra.mxu1 %v3933_v31 }
  0x98   :  { %2564 = vmatprep.subr.bf16.mxu1 %v3338_v30 }
  0x9b   :  { %2566 = vmatpush3.bf16.msra.mxu1 %v3369_v12 }
  0x9c   :  { %2568 = vmatprep.subr.bf16.mxu1 %v3389_v27 }
  0x9f   :  { %2570 = vmatpush3.bf16.msra.mxu1 %v3400_v56 }
  0xa0   :  { %2604 = vmatprep.subr.bf16.mxu1 %v2795_v15 }
 0x109   :  { %v1927_v14 = vpop.f32.mrb[0].mxu0 }
 0x10a   :  { %v1928_v43 = vpop.f32.mrb[1].mxu0 }
 0x10b   :  { %v1929_v42 = vadd.f32 %v1928_v43, %v1927_v14 }
 0x115   :  { %v1962_v20 = vpop.f32.mrb[0].mxu1 }
 0x116   :  { %v1963_v9 = vpop.f32.mrb[1].mxu1 }
 0x117   :  { %v1964_v45 = vadd.f32 %v1963_v9, %v1962_v20 }
 0x119   :  { %v393_v55 = vadd.f32 %v1964_v45, %v1929_v42 }
 0x12a   :  { %v1997_v21 = vpop.f32.mrb[2].mxu0 }
 0x12b   :  { %v1998_v41 = vpop.f32.mrb[3].mxu0 }
 0x12c   :  { %v1999_v3 = vadd.f32 %v1998_v41, %v1997_v21 }
 0x12e   :  { %v531_v63 = vadd.f32 %v1999_v3, %v393_v55 }
 0x135   :  { %v2032_v30 = vpop.f32.mrb[2].mxu1 }
 0x136   :  { %v2033_v26 = vpop.f32.mrb[3].mxu1 }
 0x137   :  { %v2034_v12 = vadd.f32 %v2033_v26, %v2032_v30 }
 0x139   :  { %v639_v19 = vadd.f32 %v2034_v12, %v531_v63  ;;  %v3934_v12 = vld [vmem:[#allocation21_spill] sm:$0xff] }
 0x14a   :  { %v2067_v27 = vpop.f32.mrb[4].mxu0 }
 0x14b   :  { %v2068_v8 = vpop.f32.mrb[5].mxu0 }
 0x14c   :  { %v2069_v56 = vadd.f32 %v2068_v8, %v2067_v27  ;;  %v3935_v27 = vld [vmem:[#allocation16_spill] sm:$0xff] }
 0x14e   :  { %v807_v31 = vadd.f32 %v2069_v56, %v639_v19 }
 0x155   :  { %v2102_v1 = vpop.f32.mrb[4].mxu1 }
 0x156   :  { %v2103_v60 = vpop.f32.mrb[5].mxu1 }
 0x157   :  { %v2104_v17 = vadd.f32 %v2103_v60, %v2102_v1 }
 0x159   :  { %v911_v14 = vadd.f32 %v2104_v17, %v807_v31 }
 0x15b   :  { %v914_v43 = vmul.f32 0.0625, %v911_v14 }
 0x15d   :  { %922 = vrot.lane.b32.xlu1 %v914_v43, %s2733_s0  ;;  %916 = vrot.lane.b32.xlu0 %v914_v43, %s2734_s30 }
 0x161   :  { %925 = vrot.lane.b32.xlu1 %v914_v43, %s2735_s5  ;;  %919 = vrot.lane.b32.xlu0 %v914_v43, %s2736_s6 }
 0x165   :  { %931 = vrot.lane.b32.xlu1 %v914_v43, %s2737_s7  ;;  %928 = vrot.lane.b32.xlu0 %v914_v43, %s2738_s8 }
 0x169   :  { %934 = vrot.lane.b32.xlu0 %v914_v43, %s2739_s9 }
 0x1cf   :  { %v923_v17 = vpop.permute.xlu1 %922  ;;  %v917_v60 = vpop.permute.xlu0 %916 }
 0x1d0   :  { %v938_v1 = vsel %vm937_vm0, %v914_v43, %v917_v60 }
 0x1d3   :  { %v926_v42 = vpop.permute.xlu1 %925  ;;  %v920_v20 = vpop.permute.xlu0 %919 }
 0x1d4   :  { %v940_v9 = vsel %vm939_vm1, %v938_v1, %v920_v20 }
 0x1d5   :  { %v942_v45 = vsel %vm941_vm2, %v940_v9, %v923_v17 }
 0x1d6   :  { %v944_v55 = vsel %vm943_vm3, %v942_v45, %v926_v42 }
 0x1d7   :  { %v929_v21 = vpop.permute.xlu0 %928  ;;  %v932_v41 = vpop.permute.xlu1 %931 }
 0x1d8   :  { %v946_v3 = vsel %vm945_vm4, %v944_v55, %v929_v21  ;;  %v3936_v21 = vld [vmem:[#allocation25_spill] sm:$0xff] }
 0x1d9   :  { %v948_v63 = vsel %vm947_vm5, %v946_v3, %v932_v41  ;;  %v3937_v41 = vld [vmem:[#allocation26_spill] sm:$0xff] }
 0x1db   :  { %v935_v30 = vpop.permute.xlu0 %934 }
 0x1dc   :  { %v950_v26 = vsel %vm949_vm6, %v948_v63, %v935_v30  ;;  %v1849_v30 = vld [vmem:[%s3768_s2] sm:$0x3]  ;;  %s2709_s2 = scalar_lea.vmem %s1888_s15, 256 }
 0x1dd   :  { %v3655_v19 = vsub.f32 %v3934_v12, %v950_v26  ;;  %v3658_v8 = vsub.f32 %v3935_v27, %v950_v26  ;;  %v1850_v26 = vld [vmem:[%s3769_s3] sm:$0x3]  ;;  %p2710_p0 = scmp.ne.s32.totalorder %s1888_s15, %s2709_s2  ;;  %p2715_p2 = scmp.lt.s32.totalorder %s2709_s2, %s2709_s2 }
 0x1df   :  { %v953_v56 = vmul.f32 %v3655_v19, %v3655_v19  ;;  %v954_v31 = vmul.f32 %v3658_v8, %v3658_v8  ;;  %p2716_p3 = por %p2715_p2, %p2714_p1 }
 0x1e1   :  { %v1051_v14 = vand.u32 4294901760, %v954_v31  ;;  %v3664_v43 = vand.u32 4294901760, %v953_v56  ;;  %p2717_p4 = pnand %p2716_p3, %p2710_p0 }
 0x1e3   :  { %v1052_v17 = vsub.f32 %v954_v31, %v1051_v14  ;;  %v1058_v60 = vsub.f32 %v953_v56, %v3664_v43  ;;  %1292 = vmatprep.mubr.f32.mxu1 %v1051_v14 }
 0x1e4   :  { %1294 = vmatmul.mubr.f32.vlgmr.msra.gmra.mrb[6].mxu1 %v3664_v43 }
 0x1e5   :  { %2606 = vmatpush3.bf16.msra.mxu1 %v2813_v22  ;;  %v1053_v1 = vand.u32 4294901760, %v1052_v17  ;;  %v1059_v42 = vand.u32 4294901760, %v1058_v60 }
 0x1e6   :  { %2608 = vmatprep.subr.bf16.mxu1 %v2815_v23 }
 0x1e7   :  { %1536 = vmatprep.mubr.f32.mxu1 %v1053_v1  ;;  %v1054_v20 = vsub.f32 %v1052_v17, %v1053_v1  ;;  %v1060_v9 = vsub.f32 %v1058_v60, %v1059_v42 }
 0x1e9   :  { %2610 = vmatpush3.bf16.msra.mxu1 %v2831_v28  ;;  %v1055_v45 = vand.u32 4294901760, %v1054_v20  ;;  %v1061_v55 = vand.u32 4294901760, %v1060_v9 }
 0x1ea   :  { %2612 = vmatprep.subr.bf16.mxu1 %v2842_v32 }
 0x1eb   :  { %1056 = vmatprep.mubr.f32.mxu0 %v1055_v45 }
 0x1ec   :  { %1062 = vmatmul.mubr.f32.vlgmr.msra.gmra.mrb[6].mxu0 %v1061_v55 }
 0x1ed   :  { %2574 = vmatpush3.bf16.msra.mxu0 %v3936_v21  ;;  %2614 = vmatpush3.bf16.msra.mxu1 %v2860_v38 }
 0x1ee   :  { %1429 = vmatprep.mubr.f32.mxu0 %v1052_v17  ;;  %2576 = vmatprep.subr.bf16.mxu0 %v3937_v41 }
 0x1ef   :  { %2616 = vmatprep.subr.bf16.mxu1 %v2883_v47 }
 0x1f1   :  { %2578 = vmatpush3.bf16.msra.mxu0 %v3380_v51  ;;  %2618 = vmatpush3.bf16.msra.mxu1 %v2925_v2 }
 0x1f2   :  { %2580 = vmatprep.subr.bf16.mxu0 %v3387_v6  ;;  %2620 = vmatprep.subr.bf16.mxu1 %v2981_v18 }
 0x1f5   :  { %2582 = vmatpush3.bf16.msra.mxu0 %v3393_v5  ;;  %2622 = vmatpush3.bf16.msra.mxu1 %v2990_v59 }
 0x1f6   :  { %2584 = vmatprep.subr.bf16.mxu0 %v3397_v49  ;;  %2624 = vmatprep.subr.bf16.mxu1 %v3035_v52 }
 0x1f9   :  { %2586 = vmatpush3.bf16.msra.mxu0 %v3469_v54  ;;  %2626 = vmatpush3.bf16.msra.mxu1 %v3087_v24 }
 0x1fa   :  { %2588 = vmatprep.subr.bf16.mxu0 %v3475_v34  ;;  %2628 = vmatprep.subr.bf16.mxu1 %v3900_v39 }
 0x1fd   :  { %2590 = vmatpush3.bf16.msra.mxu0 %v3484_v11  ;;  %2630 = vmatpush3.bf16.msra.mxu1 %v3902_v48 }
 0x1fe   :  { %2592 = vmatprep.subr.bf16.mxu0 %v3489_v36  ;;  %2632 = vmatprep.subr.bf16.mxu1 %v3903_v57 }
 0x201   :  { %2594 = vmatpush3.bf16.msra.mxu0 %v3496_v40  ;;  %2634 = vmatpush3.bf16.msra.mxu1 %v3904_v13 }
 0x202   :  { %2596 = vmatprep.subr.bf16.mxu0 %v3501_v10  ;;  %2668 = vmatprep.subr.bf16.mxu1 %v2795_v15  ;;  %v3938_v15 = vld [vmem:[#allocation11_spill] sm:$0xff]  ;;  %v1854_v10 = vlaneseq }
 0x204   :  { %1540 = vmatmul.mubr.f32.vlgmr.msra.gmra.mrb[8].mxu1 %v1059_v42 }
 0x205   :  { %2598 = vmatpush3.bf16.msra.mxu0 %v3508_v53  ;;  %2670 = vmatpush3.bf16.msra.mxu1 %v2813_v22  ;;  %v3939_v22 = vld [vmem:[#allocation20_spill] sm:$0xff] }
 0x206   :  { %1810 = vmatprep.mubr.f32.mxu1 %v1051_v14  ;;  %2600 = vmatprep.subr.bf16.mxu0 %v3513_v33 }
 0x207   :  { %2672 = vmatprep.subr.bf16.mxu1 %v2815_v23  ;;  %v3940_v23 = vld [vmem:[#allocation13_spill] sm:$0xff] }
 0x209   :  { %2602 = vmatpush3.bf16.msra.mxu0 %v3520_v50  ;;  %2674 = vmatpush3.bf16.msra.mxu1 %v2831_v28 }
 0x20a   :  { %2636 = vmatprep.subr.bf16.mxu0 %v3407_v58  ;;  %2676 = vmatprep.subr.bf16.mxu1 %v2842_v32 }
 0x20c   :  { %1432 = vmatmul.mubr.f32.vlgmr.msra.gmra.mrb[8].mxu0 %v1058_v60 }
 0x20d   :  { %2638 = vmatpush3.bf16.msra.mxu0 %v3413_v61  ;;  %1706 = vmatprep.mubr.f32.mxu0 %v1051_v14 }
 0x20e   :  { %2678 = vmatpush3.bf16.msra.mxu1 %v2860_v38  ;;  %2640 = vmatprep.subr.bf16.mxu0 %v3420_v16 }
 0x20f   :  { %2680 = vmatprep.subr.bf16.mxu1 %v2883_v47 }
 0x211   :  { %2642 = vmatpush3.bf16.msra.mxu0 %v3426_v7 }
 0x212   :  { %2682 = vmatpush3.bf16.msra.mxu1 %v2925_v2  ;;  %2644 = vmatprep.subr.bf16.mxu0 %v3432_v46 }
 0x213   :  { %2684 = vmatprep.subr.bf16.mxu1 %v2981_v18 }
 0x215   :  { %2646 = vmatpush3.bf16.msra.mxu0 %v3438_v4 }
 0x216   :  { %2686 = vmatpush3.bf16.msra.mxu1 %v2990_v59  ;;  %2648 = vmatprep.subr.bf16.mxu0 %v3445_v62 }
 0x217   :  { %2688 = vmatprep.subr.bf16.mxu1 %v3035_v52 }
 0x219   :  { %2650 = vmatpush3.bf16.msra.mxu0 %v3451_v0 }
 0x21a   :  { %2690 = vmatpush3.bf16.msra.mxu1 %v3087_v24  ;;  %2652 = vmatprep.subr.bf16.mxu0 %v3457_v37 }
 0x21b   :  { %2692 = vmatprep.subr.bf16.mxu1 %v3900_v39 }
 0x21d   :  { %2654 = vmatpush3.bf16.msra.mxu0 %v3463_v29 }
 0x21e   :  { %2694 = vmatpush3.bf16.msra.mxu1 %v3902_v48  ;;  %2656 = vmatprep.subr.bf16.mxu0 %v3552_v25  ;;  %v1855_v48 = vshrl.u32 %v1854_v10, 7 }
 0x21f   :  { %2696 = vmatprep.subr.bf16.mxu1 %v3903_v57 }
 0x221   :  { %2658 = vmatpush3.bf16.msra.mxu0 %v3561_v35  ;;  %v1856_v35 = vsub.s32 0, %v1855_v48 }
 0x222   :  { %2698 = vmatpush3.bf16.msra.mxu1 %v3904_v13  ;;  %2660 = vmatprep.subr.bf16.mxu0 %v3568_v44  ;;  %v1860_v44 = vsub.s32 1, %v1855_v48 }
 0x223   :  { %v1857_v27 = vrot.slane %v1849_v30, %v1856_v35  ;;  %v1870_v60 = vrot.slane %v1850_v26, %v1856_v35 }
 0x224   :  { %v1861_v56 = vrot.slane %v1849_v30, %v1860_v44  ;;  %v1874_v1 = vrot.slane %v1850_v26, %v1860_v44 }
 0x225   :  { %1812 = vmatmul.mubr.f32.vlgmr.msra.gmra.mrb[10].mxu1 %v3664_v43  ;;  %2662 = vmatpush3.bf16.msra.mxu0 %v3938_v15 }
 0x226   :  { %2664 = vmatprep.subr.bf16.mxu0 %v3939_v22 }
 0x229   :  { %2666 = vmatpush3.bf16.msra.mxu0 %v3940_v23 }
 0x22c   :  { %1708 = vmatmul.mubr.f32.vlgmr.msra.gmra.mrb[10].mxu0 %v3664_v43 }
 0x2b7   :  { %v2172_v28 = vpop.f32.mrb[6].mxu1 }
 0x2b8   :  { %v2173_v32 = vpop.f32.mrb[7].mxu1 }
 0x2b9   :  { %v2174_v38 = vadd.f32 %v2173_v32, %v2172_v28 }
 0x2bf   :  { %v2137_v47 = vpop.f32.mrb[6].mxu0 }
 0x2c0   :  { %v2138_v2 = vpop.f32.mrb[7].mxu0 }
 0x2c1   :  { %v2139_v18 = vadd.f32 %v2138_v2, %v2137_v47 }
 0x2c3   :  { %v1296_v59 = vadd.f32 %v2174_v38, %v2139_v18 }
 0x2d7   :  { %v2242_v52 = vpop.f32.mrb[8].mxu1 }
 0x2d8   :  { %v2243_v24 = vpop.f32.mrb[9].mxu1 }
 0x2d9   :  { %v2244_v51 = vadd.f32 %v2243_v24, %v2242_v52 }
 0x2df   :  { %v2207_v61 = vpop.f32.mrb[8].mxu0 }
 0x2e0   :  { %v2208_v49 = vpop.f32.mrb[9].mxu0 }
 0x2e1   :  { %v2209_v6 = vadd.f32 %v2208_v49, %v2207_v61 }
 0x2e3   :  { %v1434_v5 = vadd.f32 %v2209_v6, %v1296_v59 }
 0x2e5   :  { %v1542_v58 = vadd.f32 %v2244_v51, %v1434_v5 }
 0x2f8   :  { %v2312_v16 = vpop.f32.mrb[10].mxu1 }
 0x2f9   :  { %v2313_v7 = vpop.f32.mrb[11].mxu1 }
 0x2fa   :  { %v2314_v46 = vadd.f32 %v2313_v7, %v2312_v16 }
 0x2ff   :  { %v2277_v4 = vpop.f32.mrb[10].mxu0 }
 0x300   :  { %v2278_v62 = vpop.f32.mrb[11].mxu0 }
 0x301   :  { %v2279_v0 = vadd.f32 %v2278_v62, %v2277_v4 }
 0x303   :  { %v1710_v37 = vadd.f32 %v2279_v0, %v1542_v58 }
 0x305   :  { %v1814_v29 = vadd.f32 %v2314_v46, %v1710_v37 }
 0x307   :  { %v1817_v54 = vmul.f32 0.0625, %v1814_v29 }
 0x309   :  { %v1818_v34 = vadd.f32 1e-05, %v1817_v54 }
 0x30b   :  { %2707 = vrsqrt.f32 %v1818_v34 }
 0x315   :  { %v2708_v11 = vpop.eup %2707 }
 0x316   :  { %1824 = vrot.lane.b32.xlu0 %v2708_v11, %s2736_s6  ;;  %1821 = vrot.lane.b32.xlu1 %v2708_v11, %s2734_s30 }
 0x31a   :  { %1830 = vrot.lane.b32.xlu0 %v2708_v11, %s2735_s5  ;;  %1827 = vrot.lane.b32.xlu1 %v2708_v11, %s2733_s0 }
 0x31e   :  { %1836 = vrot.lane.b32.xlu0 %v2708_v11, %s2737_s7  ;;  %1833 = vrot.lane.b32.xlu1 %v2708_v11, %s2738_s8 }
 0x322   :  { %1839 = vrot.lane.b32.xlu1 %v2708_v11, %s2739_s9 }
 0x388   :  { %v1825_v36 = vpop.permute.xlu0 %1824  ;;  %v1822_v40 = vpop.permute.xlu1 %1821 }
 0x389   :  { %v1842_v53 = vsel %vm937_vm0, %v2708_v11, %v1822_v40 }
 0x38a   :  { %v1843_v50 = vsel %vm939_vm1, %v1842_v53, %v1825_v36 }
 0x38c   :  { %v1831_v33 = vpop.permute.xlu0 %1830  ;;  %v1828_v39 = vpop.permute.xlu1 %1827 }
 0x38d   :  { %v1844_v57 = vsel %vm941_vm2, %v1843_v50, %v1828_v39 }
 0x38e   :  { %v1845_v13 = vsel %vm943_vm3, %v1844_v57, %v1831_v33 }
 0x390   :  { %v1834_v25 = vpop.permute.xlu1 %1833  ;;  %v1837_v3 = vpop.permute.xlu0 %1836 }
 0x391   :  { %v1846_v63 = vsel %vm945_vm4, %v1845_v13, %v1834_v25 }
 0x392   :  { %v1847_v12 = vsel %vm947_vm5, %v1846_v63, %v1837_v3 }
 0x394   :  { %v1840_v31 = vpop.permute.xlu1 %1839 }
 0x395   :  { %v1848_v14 = vsel %vm949_vm6, %v1847_v12, %v1840_v31 }
 0x396   :  { %v1851_v43 = vmul.f32 %v1848_v14, %v3655_v19  ;;  %v1852_v17 = vmul.f32 %v1848_v14, %v3658_v8 }
 0x398   :  { %v1864_v42 = vmul.f32 %v1857_v27, %v1851_v43  ;;  %v1865_v20 = vmul.f32 %v1861_v56, %v1852_v17 }
 0x39a   :  { %v1877_v9 = vadd.f32 %v1870_v60, %v1864_v42  ;;  %v1878_v45 = vadd.f32 %v1874_v1, %v1865_v20 }
 0x39c   :  { %1879 = vst [vmem:[#allocation2] sm:$0xff] %v1877_v9  ;;  %1880 = vst [vmem:[#allocation2 + $0x8] sm:$0xff] %v1878_v45 }
 0x39d   :  { %2720 = shalt.err (!%p2717_p4)
}
 0x39e   :  { %s2721_s17 = scalar_lea.hbm %s3770_s4, 256 }
 0x39f   :  { %p2722_p5 = scmp.ne.s32.totalorder %s3770_s4, %s2721_s17  ;;  %p2725_p6 = scmp.lt.u32.totalorder %s2721_s17, %s3770_s4 }
 0x3a1   :  { %p2727_p7 = pnand %p2725_p6, %p2722_p5 }
 0x3a3   :  { %2730 = shalt.err (!%p2727_p7)
}
 0x3a4   :  { %1890 = dma.vmem_to_hbm [thread:$0]  %s1888_s15, 256, %s3770_s4, [#allocation3]  }
 0x3a5   :  { %2731 = dma.done.wait [#allocation3], 256  }
 0x3a6   :  { %2732 = vsyncadd [#allocation3], 4294967040 }
 0x3a7   :  { %1894 = vsyncpa [#allocation3], 1 }

</bundles_post_ra>
